<compile_context>
chip_gen: v5e
topology: v5e:2x2
jax: 0.10.0
libtpu: 0.0.40
codegen_flags: <defaults>
</compile_context>

<pallas_src>
import functools
import math

import jax
import jax.numpy as jnp
import numpy as np
from jax.experimental import pallas as pl
from jax.experimental.pallas import tpu as pltpu

# ---- small config (consistent with the module's forward) ----
B = 2            # batch
T = 8            # sequence length (<= block_size)
C = 32           # n_embd
N_HEAD = 4       # n_head
HEAD_D = C // N_HEAD
MASK_VALUE = -1e30   # large finite negative (exp() underflows to exactly 0)


def causal_attn_kernel(x_ref, wqkv_ref, bqkv_ref, wp_ref, bp_ref, mh_ref,
                       bias_ref, o_ref, *, batch, seq, n_head):
    """Single grid step: whole batch, all heads, lane-packed.

    x_ref    : (B*T, C)       activations, compute dtype (f32 or bf16)
    wqkv_ref : (C, 3*C)       fused [Wq*scale | Wk | Wv], compute dtype
    bqkv_ref : (1, 3*C)       fused [bq*scale | bk | bv], f32
    wp_ref   : (C, C)         output projection weight, compute dtype
    bp_ref   : (1, C)         output projection bias, f32
    mh_ref   : (B*H*T, C)     0/1 head-selection mask, compute dtype
    bias_ref : (B*T, B*H*T)   additive mask: 0 valid / -1e30 (causal + batch)
    o_ref    : (B*T, C)       output, f32
    """
    c = wp_ref.shape[0]

    x = x_ref[...]
    ct = x.dtype

    # 1) Fused QKV projection: one lane-dense MXU pass (3C = 96 output lanes).
    #    The 1/sqrt(D) scale is folded into Wq/bq at setup time.
    qkv = jnp.dot(x, wqkv_ref[...], preferred_element_type=jnp.float32)
    qkv = qkv + bqkv_ref[...]                                    # (BT, 3C) f32

    q = qkv[:, :c].astype(ct)                                    # (BT, C)
    kv = qkv[:, c:].astype(ct)                                   # (BT, 2C)

    # 2) Head-block form of K and V without any per-head slicing / concat:
    #    replicate each batch's (T, 2C) rows across the H head row-blocks
    #    (full-tile sublane reshapes + a broadcast copy, no cross-lane
    #    shuffles) and zero the other heads' columns with the 0/1 mask.
    kv_rep = jnp.broadcast_to(
        kv.reshape(batch, 1, seq, 2 * c),
        (batch, n_head, seq, 2 * c)).reshape(batch * n_head * seq, 2 * c)
    mh = mh_ref[...]                                             # (BHT, C)
    kg = kv_rep[:, :c] * mh                                      # (BHT, C)
    vg = kv_rep[:, c:] * mh                                      # (BHT, C)

    # 3) ONE lane-dense score matmul for every (batch, head) block:
    #    (BT, C) x (BHT, C)^T -> (BT, BHT).  Cross-head terms are zero by the
    #    mh masking above; cross-batch / non-causal terms are killed by the
    #    additive mask (exp() of -1e30 is exactly 0).
    s = jax.lax.dot_general(q, kg, (((1,), (1,)), ((), ())),
                            preferred_element_type=jnp.float32)  # (BT, BHT) f32
    s = s + bias_ref[...]

    # 4) Softmax over each head's T-lane segment, done on the lane-dense
    #    (BT, BHT) layout.  A single shared per-row max is subtracted (softmax
    #    is shift-invariant per segment); only pathological >~88 cross-head
    #    logit gaps could underflow a whole segment.
    m = jnp.max(s, axis=-1, keepdims=True)
    e = jnp.exp(s - m).astype(ct)                                # (BT, BHT)

    # 5) Per-(row, head) denominators via a matmul with the same 0/1 head mask
    #    (the sum lands broadcast over each head's D output columns), and the
    #    PV matmul, which lands already head-merged as (BT, C) -> the head
    #    concat disappears.  Divide goes to the EUP slot.
    l = jnp.dot(e, mh, preferred_element_type=jnp.float32)       # (BT, C)
    y = jnp.dot(e, vg, preferred_element_type=jnp.float32)       # (BT, C)
    y = y * pl.reciprocal(l + 1e-30, approx=True)

    # 6) Output projection.
    out = jnp.dot(y.astype(ct), wp_ref[...],
                  preferred_element_type=jnp.float32) + bp_ref[...]
    o_ref[...] = out.astype(o_ref.dtype)


def prepare_attention(wq, bq, wk, bk, wv, bv, wp, bp, *, batch, seq,
                      n_head=N_HEAD, compute_dtype=jnp.float32):
    """One-time setup (hoisted out of the forward path, per review):
    fuses/scales/casts the weights, builds the constant masks, and returns a
    jitted forward(x) closure.  bf16 compute is MXU-native on v5e/v6e/v7x."""
    cx = wq.shape[0]
    d = cx // n_head
    bt = batch * seq
    bht = batch * n_head * seq

    scale = 1.0 / math.sqrt(d)
    wqkv = jnp.concatenate([wq * scale, wk, wv], axis=1).astype(compute_dtype)
    bqkv = jnp.concatenate([bq * scale, bk, bv], axis=1).astype(jnp.float32)
    wp_c = wp.astype(compute_dtype)
    bp_c = bp.astype(jnp.float32)

    # Constant 0/1 head-selection mask: mh[(b,h,t'), h'*D + dd] = 1{h' == h}.
    h_of_row = np.broadcast_to(np.arange(n_head)[None, :, None],
                               (batch, n_head, seq)).reshape(-1)
    h_of_col = np.repeat(np.arange(n_head), d)
    mh = jnp.asarray((h_of_row[:, None] == h_of_col[None, :]),
                     dtype=compute_dtype)                         # (BHT, C)

    # Constant additive attention mask (same batch AND causal), 0 / -1e30.
    b_of_row = np.repeat(np.arange(batch), seq)                   # (BT,)
    t_of_row = np.tile(np.arange(seq), batch)
    b_of_col = np.broadcast_to(np.arange(batch)[:, None, None],
                               (batch, n_head, seq)).reshape(-1)  # (BHT,)
    t_of_col = np.broadcast_to(np.arange(seq)[None, None, :],
                               (batch, n_head, seq)).reshape(-1)
    valid = (b_of_row[:, None] == b_of_col[None, :]) & \
            (t_of_col[None, :] <= t_of_row[:, None])
    bias = jnp.asarray(np.where(valid, 0.0, MASK_VALUE),
                       dtype=jnp.float32)                         # (BT, BHT)

    kernel = functools.partial(causal_attn_kernel, batch=batch, seq=seq,
                               n_head=n_head)

    call = pl.pallas_call(
        kernel,
        out_shape=jax.ShapeDtypeStruct((bt, cx), jnp.float32),
        grid_spec=pltpu.PrefetchScalarGridSpec(
            num_scalar_prefetch=0,
            grid=(1,),                      # whole problem in one grid step
            in_specs=[
                pl.BlockSpec((bt, cx), lambda i: (0, 0)),         # x
                pl.BlockSpec((cx, 3 * cx), lambda i: (0, 0)),     # fused Wqkv
                pl.BlockSpec((1, 3 * cx), lambda i: (0, 0)),      # fused bias
                pl.BlockSpec((cx, cx), lambda i: (0, 0)),         # Wproj
                pl.BlockSpec((1, cx), lambda i: (0, 0)),          # bproj
                pl.BlockSpec((bht, cx), lambda i: (0, 0)),        # head mask
                pl.BlockSpec((bt, bht), lambda i: (0, 0)),        # attn mask
            ],
            out_specs=pl.BlockSpec((bt, cx), lambda i: (0, 0)),
        ),
        compiler_params=pltpu.CompilerParams(
            dimension_semantics=("arbitrary",)),
    )

    @jax.jit
    def forward(x):
        x2 = x.reshape(bt, cx).astype(compute_dtype)
        out = call(x2, wqkv, bqkv, wp_c, bp_c, mh, bias)
        return out.reshape(batch, seq, cx).astype(x.dtype)

    return forward


def reference(x, wq, bq, wk, bk, wv, bv, wp, bp):
    """Plain-JAX reference matching the PyTorch forward (eval mode)."""
    bx, tx, cx = x.shape
    d = cx // N_HEAD

    def heads(z):  # (B,T,C) -> (B,H,T,D)
        return z.reshape(bx, tx, N_HEAD, d).transpose(0, 2, 1, 3)

    q = heads(x @ wq + bq)
    k = heads(x @ wk + bk)
    v = heads(x @ wv + bv)
    att = jnp.einsum("bhtd,bhsd->bhts", q, k) * (1.0 / math.sqrt(d))
    mask = jnp.tril(jnp.ones((tx, tx), dtype=bool))
    att = jnp.where(mask[None, None], att, -jnp.inf)
    att = jax.nn.softmax(att, axis=-1)
    y = jnp.einsum("bhts,bhsd->bhtd", att, v)
    y = y.transpose(0, 2, 1, 3).reshape(bx, tx, cx)
    return y @ wp + bp


if __name__ == "__main__":
    key = jax.random.PRNGKey(0)
    keys = jax.random.split(key, 9)

    # deterministic parameter init (PyTorch Linear-like uniform bound)
    bound = 1.0 / math.sqrt(C)

    def u(k, shape):
        return jax.random.uniform(k, shape, jnp.float32, -bound, bound)

    x = jax.random.normal(keys[0], (B, T, C), jnp.float32)
    wq, bq = u(keys[1], (C, C)), u(keys[2], (1, C))
    wk, bk = u(keys[3], (C, C)), u(keys[4], (1, C))
    wv, bv = u(keys[5], (C, C)), u(keys[6], (1, C))
    wp, bp = u(keys[7], (C, C)), u(keys[8], (1, C))

    ref = reference(x, wq, bq, wk, bk, wv, bv, wp, bp)

    # f32 compute path (tolerance slack covers the EUP approximate reciprocal).
    fwd_f32 = prepare_attention(wq, bq, wk, bk, wv, bv, wp, bp,
                                batch=B, seq=T, n_head=N_HEAD,
                                compute_dtype=jnp.float32)
    out = jax.block_until_ready(fwd_f32(x))
    assert out.shape == (B, T, C)
    assert jnp.allclose(out, ref, atol=1e-2, rtol=1e-2), "f32 mismatch vs reference"

    # bf16 weights/activations (MXU-native on v5e/v6e/v7x); f32 accumulation,
    # bias adds and softmax stay f32.
    fwd_bf16 = prepare_attention(wq, bq, wk, bk, wv, bv, wp, bp,
                                 batch=B, seq=T, n_head=N_HEAD,
                                 compute_dtype=jnp.bfloat16)
    out_bf16 = jax.block_until_ready(fwd_bf16(x))
    assert jnp.allclose(out_bf16, ref, atol=7e-2, rtol=7e-2), "bf16 mismatch vs reference"

    print("KERNEL_OK")
</pallas_src>

<mosaic_0001>
module attributes {stable_mosaic.version = 11 : i64} {
  func.func @causal_attn_kernel(%arg0: i32, %arg1: memref<16x32xf32, #tpu.memory_space<vmem>>, %arg2: memref<32x96xf32, #tpu.memory_space<vmem>>, %arg3: memref<1x96xf32, #tpu.memory_space<vmem>>, %arg4: memref<32x32xf32, #tpu.memory_space<vmem>>, %arg5: memref<1x32xf32, #tpu.memory_space<vmem>>, %arg6: memref<64x32xf32, #tpu.memory_space<vmem>>, %arg7: memref<16x64xf32, #tpu.memory_space<vmem>>, %arg8: memref<16x32xf32, #tpu.memory_space<vmem>>) attributes {dimension_semantics = [#tpu.dimension_semantics<arbitrary>], iteration_bounds = array<i64: 1>, scalar_prefetch = 0 : i64, scratch_operands = 0 : i64, tpu.core_type = #tpu.core_type<tc>, window_params = [{pipeline_mode = #tpu.pipeline_mode<synchronous>, transform_indices = @transform_0, window_bounds = array<i64: 16, 32>}, {pipeline_mode = #tpu.pipeline_mode<synchronous>, transform_indices = @transform_1, window_bounds = array<i64: 32, 96>}, {pipeline_mode = #tpu.pipeline_mode<synchronous>, transform_indices = @transform_2, window_bounds = array<i64: 1, 96>}, {pipeline_mode = #tpu.pipeline_mode<synchronous>, transform_indices = @transform_3, window_bounds = array<i64: 32, 32>}, {pipeline_mode = #tpu.pipeline_mode<synchronous>, transform_indices = @transform_4, window_bounds = array<i64: 1, 32>}, {pipeline_mode = #tpu.pipeline_mode<synchronous>, transform_indices = @transform_5, window_bounds = array<i64: 64, 32>}, {pipeline_mode = #tpu.pipeline_mode<synchronous>, transform_indices = @transform_6, window_bounds = array<i64: 16, 64>}, {pipeline_mode = #tpu.pipeline_mode<synchronous>, transform_indices = @transform_7, window_bounds = array<i64: 16, 32>}]} {
    %c0 = arith.constant 0 : index
    %c0_0 = arith.constant 0 : index
    %0 = vector.load %arg1[%c0, %c0_0] : memref<16x32xf32, #tpu.memory_space<vmem>>, vector<16x32xf32>
    %c0_1 = arith.constant 0 : index
    %c0_2 = arith.constant 0 : index
    %1 = vector.load %arg2[%c0_1, %c0_2] : memref<32x96xf32, #tpu.memory_space<vmem>>, vector<32x96xf32>
    %cst = arith.constant dense<0.000000e+00> : vector<16x96xf32>
    %2 = tpu.matmul %0, %1, %cst {dimension_numbers = #tpu.dot_dimension_numbers<[1], [0], [0], [1], [0, 0, 1, 1], [], []>} : vector<16x32xf32>, vector<32x96xf32>, vector<16x96xf32> -> vector<16x96xf32>
    %c0_3 = arith.constant 0 : index
    %c0_4 = arith.constant 0 : index
    %3 = vector.load %arg3[%c0_3, %c0_4] : memref<1x96xf32, #tpu.memory_space<vmem>>, vector<1x96xf32>
    %4 = vector.broadcast %3 : vector<1x96xf32> to vector<16x96xf32>
    %5 = arith.addf %2, %4 : vector<16x96xf32>
    %6 = vector.extract_strided_slice %5 {offsets = [0, 0], sizes = [16, 32], strides = [1, 1]} : vector<16x96xf32> to vector<16x32xf32>
    %7 = vector.extract_strided_slice %5 {offsets = [0, 32], sizes = [16, 64], strides = [1, 1]} : vector<16x96xf32> to vector<16x64xf32>
    %8 = vector.shape_cast %7 : vector<16x64xf32> to vector<2x1x8x64xf32>
    %9 = vector.shape_cast %8 : vector<2x1x8x64xf32> to vector<2x1x8x64xf32>
    %10 = vector.broadcast %9 : vector<2x1x8x64xf32> to vector<2x4x8x64xf32>
    %11 = vector.shape_cast %10 : vector<2x4x8x64xf32> to vector<64x64xf32>
    %c0_5 = arith.constant 0 : index
    %c0_6 = arith.constant 0 : index
    %12 = vector.load %arg6[%c0_5, %c0_6] : memref<64x32xf32, #tpu.memory_space<vmem>>, vector<64x32xf32>
    %13 = vector.extract_strided_slice %11 {offsets = [0, 0], sizes = [64, 32], strides = [1, 1]} : vector<64x64xf32> to vector<64x32xf32>
    %14 = arith.mulf %13, %12 : vector<64x32xf32>
    %15 = vector.extract_strided_slice %11 {offsets = [0, 32], sizes = [64, 32], strides = [1, 1]} : vector<64x64xf32> to vector<64x32xf32>
    %16 = arith.mulf %15, %12 : vector<64x32xf32>
    %cst_7 = arith.constant dense<0.000000e+00> : vector<16x64xf32>
    %17 = tpu.matmul %6, %14, %cst_7 {dimension_numbers = #tpu.dot_dimension_numbers<[1], [1], [0], [0], [0, 0, 1, 0], [], []>} : vector<16x32xf32>, vector<64x32xf32>, vector<16x64xf32> -> vector<16x64xf32>
    %c0_8 = arith.constant 0 : index
    %c0_9 = arith.constant 0 : index
    %18 = vector.load %arg7[%c0_8, %c0_9] : memref<16x64xf32, #tpu.memory_space<vmem>>, vector<16x64xf32>
    %19 = arith.addf %17, %18 : vector<16x64xf32>
    %cst_10 = arith.constant dense<0xFF800000> : vector<16xf32>
    %20 = vector.multi_reduction <maximumf>, %19, %cst_10 [1] : vector<16x64xf32> to vector<16xf32>
    %21 = vector.shape_cast %20 : vector<16xf32> to vector<16x1xf32>
    %22 = vector.broadcast %21 : vector<16x1xf32> to vector<16x64xf32>
    %23 = arith.subf %19, %22 : vector<16x64xf32>
    %24 = math.exp %23 : vector<16x64xf32>
    %cst_11 = arith.constant dense<0.000000e+00> : vector<16x32xf32>
    %25 = tpu.matmul %24, %12, %cst_11 {dimension_numbers = #tpu.dot_dimension_numbers<[1], [0], [0], [1], [0, 0, 1, 1], [], []>} : vector<16x64xf32>, vector<64x32xf32>, vector<16x32xf32> -> vector<16x32xf32>
    %cst_12 = arith.constant dense<0.000000e+00> : vector<16x32xf32>
    %26 = tpu.matmul %24, %16, %cst_12 {dimension_numbers = #tpu.dot_dimension_numbers<[1], [0], [0], [1], [0, 0, 1, 1], [], []>} : vector<16x64xf32>, vector<64x32xf32>, vector<16x32xf32> -> vector<16x32xf32>
    %cst_13 = arith.constant 1.000000e-30 : f32
    %27 = vector.broadcast %cst_13 : f32 to vector<16x32xf32>
    %28 = arith.addf %25, %27 : vector<16x32xf32>
    %29 = tpu.reciprocal %28 {approx = true} : vector<16x32xf32> -> vector<16x32xf32>
    %30 = arith.mulf %26, %29 : vector<16x32xf32>
    %c0_14 = arith.constant 0 : index
    %c0_15 = arith.constant 0 : index
    %31 = vector.load %arg4[%c0_14, %c0_15] : memref<32x32xf32, #tpu.memory_space<vmem>>, vector<32x32xf32>
    %cst_16 = arith.constant dense<0.000000e+00> : vector<16x32xf32>
    %32 = tpu.matmul %30, %31, %cst_16 {dimension_numbers = #tpu.dot_dimension_numbers<[1], [0], [0], [1], [0, 0, 1, 1], [], []>} : vector<16x32xf32>, vector<32x32xf32>, vector<16x32xf32> -> vector<16x32xf32>
    %c0_17 = arith.constant 0 : index
    %c0_18 = arith.constant 0 : index
    %33 = vector.load %arg5[%c0_17, %c0_18] : memref<1x32xf32, #tpu.memory_space<vmem>>, vector<1x32xf32>
    %34 = vector.broadcast %33 : vector<1x32xf32> to vector<16x32xf32>
    %35 = arith.addf %32, %34 : vector<16x32xf32>
    %c0_19 = arith.constant 0 : index
    %c0_20 = arith.constant 0 : index
    %36 = vector.load %arg8[%c0_19, %c0_20] : memref<16x32xf32, #tpu.memory_space<vmem>>, vector<16x32xf32>
    tpu.vector_store %arg8[%c0_19, %c0_20], %35 {strides = array<i32>} : memref<16x32xf32, #tpu.memory_space<vmem>>, vector<16x32xf32>,
    return
  }
  func.func @transform_0(%arg0: i32) -> (i32, i32) {
    %c0_i32 = arith.constant 0 : i32
    %c0_i32_0 = arith.constant 0 : i32
    %c0_i32_1 = arith.constant 0 : i32
    return %c0_i32, %c0_i32_0 : i32, i32
  }
  func.func @transform_1(%arg0: i32) -> (i32, i32) {
    %c0_i32 = arith.constant 0 : i32
    %c0_i32_0 = arith.constant 0 : i32
    %c0_i32_1 = arith.constant 0 : i32
    return %c0_i32, %c0_i32_0 : i32, i32
  }
  func.func @transform_2(%arg0: i32) -> (i32, i32) {
    %c0_i32 = arith.constant 0 : i32
    %c0_i32_0 = arith.constant 0 : i32
    %c0_i32_1 = arith.constant 0 : i32
    return %c0_i32, %c0_i32_0 : i32, i32
  }
  func.func @transform_3(%arg0: i32) -> (i32, i32) {
    %c0_i32 = arith.constant 0 : i32
    %c0_i32_0 = arith.constant 0 : i32
    %c0_i32_1 = arith.constant 0 : i32
    return %c0_i32, %c0_i32_0 : i32, i32
  }
  func.func @transform_4(%arg0: i32) -> (i32, i32) {
    %c0_i32 = arith.constant 0 : i32
    %c0_i32_0 = arith.constant 0 : i32
    %c0_i32_1 = arith.constant 0 : i32
    return %c0_i32, %c0_i32_0 : i32, i32
  }
  func.func @transform_5(%arg0: i32) -> (i32, i32) {
    %c0_i32 = arith.constant 0 : i32
    %c0_i32_0 = arith.constant 0 : i32
    %c0_i32_1 = arith.constant 0 : i32
    return %c0_i32, %c0_i32_0 : i32, i32
  }
  func.func @transform_6(%arg0: i32) -> (i32, i32) {
    %c0_i32 = arith.constant 0 : i32
    %c0_i32_0 = arith.constant 0 : i32
    %c0_i32_1 = arith.constant 0 : i32
    return %c0_i32, %c0_i32_0 : i32, i32
  }
  func.func @transform_7(%arg0: i32) -> (i32, i32) {
    %c0_i32 = arith.constant 0 : i32
    %c0_i32_0 = arith.constant 0 : i32
    %c0_i32_1 = arith.constant 0 : i32
    return %c0_i32, %c0_i32_0 : i32, i32
  }
}

</mosaic_0001>

<bundles_post_ra>
// kernel: forward.1
= control target key start
LH: loop header
LB: loop body
LE: loop exit
PB: predicated region body
PF: predicated region fallthrough
CT: control target
= control target key end

     0   :  { %12 = vsyncpa [#allocation3], 0  ;;  %s824_s0 = inlined_call_operand.hbm [shape: f32[16,32], index: 0, kind: input, shape index: {}]   ;;  %s825_s1 = inlined_call_operand.hbm [shape: f32[32,96], index: 1, kind: input, shape index: {}]   ;;  %s826_s2 = inlined_call_operand.vmem [shape: f32[1,96], index: 2, kind: input, shape index: {}]   ;;  %s827_s3 = inlined_call_operand.hbm [shape: f32[32,32], index: 3, kind: input, shape index: {}]   ;;  %s828_s4 = inlined_call_operand.vmem [shape: f32[1,32], index: 4, kind: input, shape index: {}]   ;;  %s829_s5 = inlined_call_operand.hbm [shape: f32[64,32], index: 5, kind: input, shape index: {}]   ;;  %s830_s6 = inlined_call_operand.hbm [shape: f32[16,64], index: 6, kind: input, shape index: {}]   ;;  %s831_s7 = inlined_call_operand.hbm [shape: f32[16,32], index: 7, kind: output, shape index: {}]  }
   0x1   :  { %13 = vsyncpa [#allocation6], 0 }
   0x2   :  { %14 = vsyncpa [#allocation9], 0 }
   0x3   :  { %15 = vsyncpa [#allocation4], 0  ;;  %s33_s26 = sshll.u32 %s825_s1, 4  ;;  %s668_s27 = smov [#allocation5]   ;;  %s34_s26 = int_to_ptr.hbm [resolvable:$true] %s33_s26 }
   0x4   :  { %s35_s28 = sshll.u32 %s668_s27, 4  ;;  %s63_s8 = sshll.u32 %s829_s5, 4  ;;  %s36_s28 = int_to_ptr.vmem [resolvable:$true] %s35_s28  ;;  %s64_s8 = int_to_ptr.hbm [resolvable:$true] %s63_s8 }
   0x5   :  { %s669_s9 = smov 128   ;;  %s670_s10 = smov 8  }
   0x6   :  { %41 = dma.hbm_to_vmem [thread:$0]  %s34_s26, 512, %s36_s28, [#allocation6], %s669_s9, %s669_s9, %s670_s10  }
   0x7   :  { %s671_s11 = smov [#allocation8]   ;;  %s20_s1 = sshll.u32 %s824_s0, 4  ;;  %s21_s1 = int_to_ptr.hbm [resolvable:$true] %s20_s1 }
   0x8   :  { %s65_s12 = sshll.u32 %s671_s11, 4  ;;  %s48_s16 = sshll.u32 %s827_s3, 4  ;;  %s66_s12 = int_to_ptr.vmem [resolvable:$true] %s65_s12  ;;  %s49_s16 = int_to_ptr.hbm [resolvable:$true] %s48_s16 }
   0x9   :  { %71 = dma.hbm_to_vmem [thread:$0]  %s64_s8, 1024, %s66_s12, [#allocation9], %s669_s9, %s669_s9, %s670_s10  }
   0xa   :  { %s672_s17 = smov [#allocation2]   ;;  %s673_s19 = smov [#allocation7]  }
   0xb   :  { %s22_s18 = sshll.u32 %s672_s17, 4  ;;  %s50_s0 = sshll.u32 %s673_s19, 4  ;;  %s23_s18 = int_to_ptr.vmem [resolvable:$true] %s22_s18  ;;  %s51_s0 = int_to_ptr.vmem [resolvable:$true] %s50_s0 }
   0xc   :  { %28 = dma.hbm_to_vmem [thread:$0]  %s21_s1, 256, %s23_s18, [#allocation3], %s669_s9, %s669_s9, %s670_s10  }
   0xd   :  { %s76_s22 = sshll.u32 %s830_s6, 4  ;;  %s674_s3 = smov [#allocation10]   ;;  %s77_s22 = int_to_ptr.hbm [resolvable:$true] %s76_s22 }
   0xe   :  { %56 = dma.hbm_to_vmem [thread:$0]  %s49_s16, 512, %s51_s0, [#allocation6], %s669_s9, %s669_s9, %s670_s10  }
   0xf   :  { %s78_s23 = sshll.u32 %s674_s3, 4  ;;  %s79_s23 = int_to_ptr.vmem [resolvable:$true] %s78_s23 }
  0x10   :  { %84 = dma.hbm_to_vmem [thread:$0]  %s77_s22, 256, %s79_s23, [#allocation9], %s669_s9, %s669_s9, %s670_s10  }
  0x11   :  { %660 = dma.done.wait [#allocation3], 256  }
  0x12   :  { %661 = vsyncadd [#allocation3], 4294967040 }
  0x13   :  { %662 = dma.done.wait [#allocation6], 1024  }
  0x14   :  { %663 = vsyncadd [#allocation6], 4294966272 }
  0x15   :  { %664 = dma.done.wait [#allocation9], 1280  }
  0x16   :  { %665 = vsyncadd [#allocation9], 4294966016  ;;  %v110_v0 = vld [vmem:[#allocation5 + $0x18] sm:$0xff]  ;;  %v109_v1 = vld [vmem:[#allocation5 + $0x10] sm:$0xff]  ;;  %s675_s6 = smov 32   ;;  %vm115_vm0 = vcmask 261120  }
  0x17   :  { %v749_v2 = vld [vmem:[#allocation8 + $0x38] sm:$0xff]  ;;  %134 = vmatpush.msra.mxu0 %v110_v0  ;;  %v753_v3 = vld [vmem:[#allocation8 + $0x28] sm:$0xff]  ;;  %v151_v5 = vld [vmem:[#allocation8 + $0x30] sm:$0xff]  ;;  %s676_s26 = smov 96   ;;  %vm296_vm1 = vcmask 523264   ;;  %s678_s29 = smov [#allocation11]  }
  0x18   :  { %175 = vrot.lane.b32.xlu0 %v749_v2, %s675_s6  ;;  %171 = vrot.lane.b32.xlu1 %v753_v3, %s675_s6  ;;  %v108_v4 = vld [vmem:[#allocation5 + $0x8] sm:$0xff]  ;;  %v107_v6 = vld [vmem:[#allocation5] sm:$0xff]  ;;  %v148_v7 = vld [vmem:[#allocation8 + $0x18] sm:$0xff]  ;;  %s440_s30 = sshll.u32 %s678_s29, 4  ;;  %s442_s12 = sshll.u32 %s831_s7, 4  ;;  %s441_s30 = int_to_ptr.vmem [resolvable:$true] %s440_s30  ;;  %s443_s12 = int_to_ptr.hbm [resolvable:$true] %s442_s12 }
  0x19   :  { %378 = vmatpush.msra.mxu3 %v749_v2  ;;  %135 = vmatpush.msra.mxu0 %v109_v1  ;;  %v105_v8 = vld [vmem:[#allocation2] sm:$0xff]  ;;  %v149_v9 = vld [vmem:[#allocation8 + $0x20] sm:$0xff]  ;;  %v106_v11 = vld [vmem:[#allocation2 + $0x8] sm:$0xff] }
  0x1a   :  { %167 = vrot.lane.b32.xlu2 %v148_v7, %s675_s6  ;;  %v147_v10 = vld [vmem:[#allocation8 + $0x10] sm:$0xff]  ;;  %v146_v12 = vld [vmem:[#allocation8 + $0x8] sm:$0xff]  ;;  %v145_v13 = vld [vmem:[#allocation8] sm:$0xff] }
  0x1b   :  { %379 = vmatpush.msra.mxu3 %v151_v5  ;;  %136 = vmatpush.msra.mxu0 %v108_v4  ;;  %v506_v18 = vld [vmem:[%s826_s2] ss:$0 sm:$0xff]  ;;  %s677_s2 = smov 64  }
  0x1d   :  { %380 = vmatpush.msra.mxu3 %v753_v3  ;;  %137 = vmatpush.msra.mxu0 %v107_v6 }
  0x1e   :  { %457 = vmatmul.msk.f32.vlgmr.msra.gmra.mxu0 %vm115_vm0, %v105_v8 }
  0x1f   :  { %381 = vmatpush.msra.mxu3 %v149_v9 }
  0x20   :  { %173 = vrot.lane.b32.xlu0 %v151_v5, %s675_s6  ;;  %169 = vrot.lane.b32.xlu1 %v149_v9, %s675_s6 }
  0x21   :  { %382 = vmatpush.msra.mxu3 %v148_v7 }
  0x22   :  { %165 = vrot.lane.b32.xlu2 %v147_v10, %s675_s6 }
  0x23   :  { %383 = vmatpush.msra.mxu3 %v147_v10 }
  0x25   :  { %384 = vmatpush.msra.mxu3 %v146_v12 }
  0x26   :  { %458 = vmatmul.msk.f32.gmra.mxu0 %vm115_vm0, %v106_v11 }
  0x27   :  { %385 = vmatpush.msra.mxu3 %v145_v13 }
  0x28   :  { %163 = vrot.lane.b32.xlu0 %v146_v12, %s675_s6  ;;  %161 = vrot.lane.b32.xlu1 %v145_v13, %s675_s6 }
  0x74   :  { %v168_v17 = vpop.permute.xlu2 %167 }
  0x7c   :  { %v166_v27 = vpop.permute.xlu2 %165 }
  0x8a   :  { %v176_v14 = vpop.permute.xlu0 %175  ;;  %v172_v16 = vpop.permute.xlu1 %171 }
  0x92   :  { %v174_v21 = vpop.permute.xlu0 %173  ;;  %v170_v25 = vpop.permute.xlu1 %169 }
  0x9a   :  { %v164_v31 = vpop.permute.xlu0 %163  ;;  %v162_v32 = vpop.permute.xlu1 %161 }
  0x9b   :  { %v139_v15 = vpop.f32.mrf.mxu0 }
  0x9c   :  { %v140_v26 = vadd.f32 %v506_v18, %v139_v15 }
  0x9e   :  { %v188_v29 = vmul.f32 %v168_v17, %v140_v26  ;;  %v187_v30 = vmul.f32 %v166_v27, %v140_v26  ;;  %v186_v33 = vmul.f32 %v164_v31, %v140_v26  ;;  %v185_v34 = vmul.f32 %v162_v32, %v140_v26 }
  0xa3   :  { %v142_v19 = vpop.f32.mrf.mxu0 }
  0xa4   :  { %v770_v20 = vadd.f32 %v506_v18, %v142_v19  ;;  %v400_v19 = vld [vmem:[#allocation7 + $0x18] sm:$0xff] }
  0xa5   :  { %423 = vmatpush.msrb.mxu0 %v400_v19 }
  0xa6   :  { %v192_v22 = vmul.f32 %v176_v14, %v770_v20  ;;  %v191_v23 = vmul.f32 %v174_v21, %v770_v20  ;;  %v190_v24 = vmul.f32 %v172_v16, %v770_v20  ;;  %v189_v28 = vmul.f32 %v170_v25, %v770_v20 }
  0xa8   :  { %249 = vrot.lane.b32.xlu2 %v192_v22, %s676_s26  ;;  %247 = vrot.lane.b32.xlu0 %v191_v23, %s676_s26 }
  0xa9   :  { %245 = vrot.lane.b32.xlu1 %v190_v24, %s676_s26 }
  0xb0   :  { %243 = vrot.lane.b32.xlu2 %v189_v28, %s676_s26  ;;  %241 = vrot.lane.b32.xlu0 %v188_v29, %s676_s26  ;;  %v399_v28 = vld [vmem:[#allocation7 + $0x10] sm:$0xff]  ;;  %v398_v29 = vld [vmem:[#allocation7 + $0x8] sm:$0xff] }
  0xb1   :  { %239 = vrot.lane.b32.xlu1 %v187_v30, %s676_s26  ;;  %424 = vmatpush.msrb.mxu0 %v399_v28  ;;  %v397_v30 = vld [vmem:[#allocation7] sm:$0xff] }
  0xb3   :  { %425 = vmatpush.msrb.mxu0 %v398_v29 }
  0xb5   :  { %426 = vmatpush.msrb.mxu0 %v397_v30 }
  0xb8   :  { %237 = vrot.lane.b32.xlu2 %v186_v33, %s676_s26  ;;  %235 = vrot.lane.b32.xlu0 %v185_v34, %s676_s26 }
  0xb9   :  { %207 = vrot.lane.b32.xlu1 %v749_v2, %s677_s2 }
  0xc0   :  { %205 = vrot.lane.b32.xlu2 %v151_v5, %s677_s2  ;;  %203 = vrot.lane.b32.xlu0 %v753_v3, %s677_s2  ;;  %v225_v5 = vld [vmem:[#allocation10] sm:$0xff] }
  0xc1   :  { %201 = vrot.lane.b32.xlu1 %v149_v9, %s677_s2 }
  0xc8   :  { %199 = vrot.lane.b32.xlu2 %v148_v7, %s677_s2  ;;  %197 = vrot.lane.b32.xlu0 %v147_v10, %s677_s2 }
  0xc9   :  { %195 = vrot.lane.b32.xlu1 %v146_v12, %s677_s2  ;;  %v226_v12 = vld [vmem:[#allocation10 + $0x8] sm:$0xff] }
  0xd0   :  { %193 = vrot.lane.b32.xlu2 %v145_v13, %s677_s2 }
 0x102   :  { %v250_v35 = vpop.permute.xlu2 %249 }
 0x103   :  { %459 = vmatpush.xpose.msk.msra.mxu1 %vm115_vm0, %v250_v35 }
 0x10a   :  { %v244_v36 = vpop.permute.xlu2 %243 }
 0x112   :  { %v238_v39 = vpop.permute.xlu2 %237 }
 0x11a   :  { %v248_v37 = vpop.permute.xlu0 %247  ;;  %v206_v42 = vpop.permute.xlu2 %205 }
 0x11b   :  { %v246_v38 = vpop.permute.xlu1 %245  ;;  %460 = vmatpush.xpose.msk.msra.mxu1 %vm115_vm0, %v248_v37  ;;  %v223_v45 = vmul.f32 %v206_v42, %v770_v20 }
 0x11f   :  { %461 = vmatpush.xpose.msk.msra.mxu1 %vm115_vm0, %v246_v38 }
 0x122   :  { %v242_v40 = vpop.permute.xlu0 %241  ;;  %v200_v53 = vpop.permute.xlu2 %199 }
 0x123   :  { %v240_v41 = vpop.permute.xlu1 %239  ;;  %462 = vmatpush.xpose.msk.msra.mxu1 %vm115_vm0, %v244_v36  ;;  %v220_v55 = vmul.f32 %v200_v53, %v140_v26 }
 0x127   :  { %463 = vmatpush.xpose.msk.msra.mxu1 %vm115_vm0, %v242_v40 }
 0x12a   :  { %v236_v43 = vpop.permute.xlu0 %235  ;;  %v194_v59 = vpop.permute.xlu2 %193 }
 0x12b   :  { %v208_v44 = vpop.permute.xlu1 %207  ;;  %464 = vmatpush.xpose.msk.msra.mxu1 %vm115_vm0, %v240_v41  ;;  %v217_v61 = vmul.f32 %v194_v59, %v140_v26  ;;  %v507_v41 = vld [vmem:[%s828_s4] ss:$0 sm:$0xff] }
 0x12c   :  { %v224_v46 = vmul.f32 %v208_v44, %v770_v20 }
 0x12e   :  { %v486_v47 = vpack.i.bf16 %v223_v45, %v224_v46 }
 0x12f   :  { %465 = vmatpush.xpose.msk.msra.mxu1 %vm115_vm0, %v238_v39 }
 0x130   :  { %487 = vrot.lane.b32.xlu1 %v486_v47, %s677_s2 }
 0x132   :  { %v204_v48 = vpop.permute.xlu0 %203 }
 0x133   :  { %v202_v49 = vpop.permute.xlu1 %201  ;;  %v222_v50 = vmul.f32 %v204_v48, %v770_v20  ;;  %466 = vmatpush.xpose.msk.msra.mxu1 %vm115_vm0, %v236_v43 }
 0x134   :  { %v221_v51 = vmul.f32 %v202_v49, %v770_v20 }
 0x136   :  { %v491_v52 = vpack.i.bf16 %v221_v51, %v222_v50  ;;  %467 = vmatmul.msk.f32.vlgmr.msra.gmra.mxu1 %vm115_vm0, %v140_v26 }
 0x138   :  { %492 = vrot.lane.b32.xlu1 %v491_v52, %s677_s2 }
 0x13a   :  { %v198_v54 = vpop.permute.xlu0 %197 }
 0x13b   :  { %v219_v56 = vmul.f32 %v198_v54, %v140_v26  ;;  %v196_v58 = vpop.permute.xlu1 %195 }
 0x13c   :  { %v218_v60 = vmul.f32 %v196_v58, %v140_v26 }
 0x13d   :  { %v496_v57 = vpack.i.bf16 %v219_v56, %v220_v55 }
 0x13e   :  { %468 = vmatmul.msk.f32.gmra.mxu1 %vm115_vm0, %v770_v20  ;;  %v501_v62 = vpack.i.bf16 %v217_v61, %v218_v60 }
 0x140   :  { %497 = vrot.lane.b32.xlu1 %v496_v57, %s677_s2 }
 0x148   :  { %502 = vrot.lane.b32.xlu1 %v501_v62, %s677_s2 }
 0x1a2   :  { %v488_v63 = vpop.permute.xlu1 %487 }
 0x1a3   :  { %v489_v0 = vunpack.i.l.bf16 %v488_v63  ;;  %v490_v1 = vunpack.i.h.bf16 %v488_v63 }
 0x1a5   :  { %355 = vmatpush.msra.mxu2 %v489_v0 }
 0x1a7   :  { %356 = vmatpush.msra.mxu2 %v490_v1 }
 0x1aa   :  { %v493_v2 = vpop.permute.xlu1 %492 }
 0x1ab   :  { %v494_v3 = vunpack.i.l.bf16 %v493_v2  ;;  %v495_v4 = vunpack.i.h.bf16 %v493_v2 }
 0x1ad   :  { %357 = vmatpush.msra.mxu2 %v494_v3 }
 0x1af   :  { %358 = vmatpush.msra.mxu2 %v495_v4 }
 0x1b2   :  { %v498_v6 = vpop.permute.xlu1 %497 }
 0x1b3   :  { %v290_v7 = vpop.f32.mrf.mxu1  ;;  %v499_v8 = vunpack.i.l.bf16 %v498_v6  ;;  %v500_v10 = vunpack.i.h.bf16 %v498_v6 }
 0x1b4   :  { %v291_v9 = vadd.f32 %v290_v7, %v225_v5 }
 0x1b5   :  { %359 = vmatpush.msra.mxu2 %v499_v8 }
 0x1b6   :  { %v297_v11 = vsel %vm296_vm1, %v291_v9, -inf }
 0x1b7   :  { %360 = vmatpush.msra.mxu2 %v500_v10  ;;  %298 = vmax.xlane.f32.xlu0 %v297_v11 }
 0x1ba   :  { %v503_v13 = vpop.permute.xlu1 %502 }
 0x1bb   :  { %v504_v14 = vunpack.i.l.bf16 %v503_v13  ;;  %v293_v15 = vpop.f32.mrf.mxu1  ;;  %v505_v17 = vunpack.i.h.bf16 %v503_v13 }
 0x1bc   :  { %v294_v16 = vadd.f32 %v293_v15, %v226_v12 }
 0x1bd   :  { %361 = vmatpush.msra.mxu2 %v504_v14 }
 0x1be   :  { %v300_v18 = vsel %vm296_vm1, %v294_v16, -inf }
 0x1bf   :  { %362 = vmatpush.msra.mxu2 %v505_v17  ;;  %301 = vmax.xlane.f32.xlu2 %v300_v18 }
 0x22a   :  { %v299_v20 = vpop.xlane.xlu0 %298 }
 0x22b   :  { %v303_v21 = vsub.f32 %v291_v9, %v299_v20 }
 0x22d   :  { %v305_v22 = vmul.f32 1.442695, %v303_v21 }
 0x22f   :  { %508 = vpow2.f32 %v305_v22 }
 0x232   :  { %v302_v23 = vpop.xlane.xlu2 %301 }
 0x233   :  { %v304_v24 = vsub.f32 %v294_v16, %v302_v23 }
 0x235   :  { %v509_v25 = vpop.eup %508  ;;  %v307_v26 = vmul.f32 1.442695, %v304_v24 }
 0x236   :  { %469 = vmatmul.msk.f32.vlgmr.msra.gmra.mxu2 %vm296_vm1, %v509_v25  ;;  %471 = vmatmul.msk.f32.vlgmr.msra.gmra.mxu3 %vm296_vm1, %v509_v25 }
 0x237   :  { %510 = vpow2.f32 %v307_v26 }
 0x23d   :  { %v511_v27 = vpop.eup %510 }
 0x23e   :  { %470 = vmatmul.msk.f32.gmra.mxu2 %vm296_vm1, %v511_v27  ;;  %472 = vmatmul.msk.f32.gmra.mxu3 %vm296_vm1, %v511_v27 }
 0x2b9   :  { %v387_v31 = vpop.f32.mrf.mxu3  ;;  %v364_v33 = vpop.f32.mrf.mxu2 }
 0x2ba   :  { %v388_v32 = vadd.f32 1e-30, %v387_v31 }
 0x2bc   :  { %512 = vrcp.f32 %v388_v32 }
 0x2c1   :  { %v390_v34 = vpop.f32.mrf.mxu3  ;;  %v367_v39 = vpop.f32.mrf.mxu2 }
 0x2c2   :  { %v513_v35 = vpop.eup %512  ;;  %v391_v36 = vadd.f32 1e-30, %v390_v34 }
 0x2c3   :  { %v395_v37 = vmul.f32 %v513_v35, %v364_v33 }
 0x2c4   :  { %514 = vrcp.f32 %v391_v36 }
 0x2c5   :  { %473 = vmatmul.msk.f32.vlgmr.msrb.gmra.mxu0 %vm115_vm0, %v395_v37 }
 0x2ca   :  { %v515_v38 = vpop.eup %514 }
 0x2cb   :  { %v396_v40 = vmul.f32 %v515_v38, %v367_v39 }
 0x2cd   :  { %474 = vmatmul.msk.f32.gmra.mxu0 %vm115_vm0, %v396_v40 }
 0x342   :  { %v428_v42 = vpop.f32.mrf.mxu0 }
 0x343   :  { %v429_v43 = vadd.f32 %v507_v41, %v428_v42 }
 0x345   :  { %434 = vst.msk [vmem:[#allocation11] sm:$0xff] %vm115_vm0, %v429_v43 }
 0x34a   :  { %v431_v44 = vpop.f32.mrf.mxu0 }
 0x34b   :  { %v432_v45 = vadd.f32 %v507_v41, %v431_v44 }
 0x34d   :  { %435 = vst.msk [vmem:[#allocation11 + $0x8] sm:$0xff] %vm115_vm0, %v432_v45 }
 0x34e   :  { %448 = dma.vmem_to_hbm [thread:$0]  %s441_s30, 256, %s443_s12, [#allocation4], %s669_s9, %s669_s9, %s670_s10  }
 0x34f   :  { %666 = dma.done.wait [#allocation4], 256  }
 0x350   :  { %667 = vsyncadd [#allocation4], 4294967040 }
 0x351   :  { %453 = vsyncpa [#allocation3], 1 }
 0x352   :  { %454 = vsyncpa [#allocation6], 1 }
 0x353   :  { %455 = vsyncpa [#allocation9], 1 }
 0x354   :  { %456 = vsyncpa [#allocation4], 1 }

</bundles_post_ra>
